<compile_context>
chip_gen: v7x
topology: tpu7x:2x2x1
jax: 0.10.0
libtpu: 0.0.40
codegen_flags: <defaults>
</compile_context>

<pallas_src>
import jax
import jax.numpy as jnp
from jax.experimental import pallas as pl
from jax.experimental.pallas import tpu as pltpu


_LANE = 128
_SUBLANE = 8


def _round_up(x, m):
    return ((x + m - 1) // m) * m


def _downstream_prompt_kernel(w_ref, g_ref, o_ref):
    # w_ref: (1, Dp) weight row — same block every grid step (resident in VMEM).
    # g_ref / o_ref: (tn, Dp) row tiles.
    # Pure VPU sublane-broadcast multiply in the native dtype; no MXU, no XLU.
    o_ref[...] = (w_ref[...] * g_ref[...]).astype(o_ref.dtype)


def _choose_row_tile(n_rows, d_pad, itemsize, vmem_block_budget):
    """Pick a sublane-aligned row tile sized by VMEM bytes, not a fixed row count."""
    # Pipelined footprint ~ 4 * tn * Dp * itemsize
    # (2 double-buffered input blocks + 2 double-buffered output blocks; the (1, Dp)
    #  weight block is negligible).
    per_row = 4 * d_pad * itemsize
    tn = max(_SUBLANE, (vmem_block_budget // per_row) // _SUBLANE * _SUBLANE)
    # Guarantee at least 2 grid steps when the row count allows it, so both v7x
    # TensorCores get work on this memory-bound op.
    if n_rows >= 2 * _SUBLANE:
        tn = min(tn, _round_up(pl.cdiv(n_rows, 2), _SUBLANE))
    # Never larger than the (sublane-rounded) row count.
    tn = min(tn, max(_SUBLANE, _round_up(n_rows, _SUBLANE)))
    return tn


def downstream_prompt_forward(
    weight,
    graph_embedding,
    *,
    min_pallas_bytes=2 << 20,      # below this, skip the custom call entirely
    vmem_block_budget=16 << 20,    # target bytes for the pipelined blocks (fits all gens)
    donate_embedding=False,        # alias graph_embedding -> output when caller allows
):
    """weight: (1, D), graph_embedding: (N, D) -> (N, D) = weight * graph_embedding."""
    N, D = graph_embedding.shape
    assert weight.shape == (1, D), (weight.shape, (1, D))

    out_dtype = jnp.result_type(weight.dtype, graph_embedding.dtype)
    itemsize = jnp.dtype(graph_embedding.dtype).itemsize

    # Tiny inputs: fixed launch + pipeline prologue dwarfs ~KBs of HBM traffic and a
    # custom call blocks XLA from fusing this multiply into its consumer.
    # TODO(synk): at production scale, fuse this multiply into the consumer op instead.
    if N * D * itemsize < min_pallas_bytes:
        return (weight * graph_embedding).astype(out_dtype)

    # Lane-dense last dim: pad D up to a multiple of 128 (full-width unmasked stores).
    d_pad = _round_up(D, _LANE)
    w = weight
    g = graph_embedding
    if d_pad != D:
        w = jnp.pad(w, ((0, 0), (0, d_pad - D)))
        g = jnp.pad(g, ((0, 0), (0, d_pad - D)))

    tn = _choose_row_tile(N, d_pad, itemsize, vmem_block_budget)
    grid = (pl.cdiv(N, tn),)

    cost = pl.CostEstimate(
        flops=N * d_pad,
        transcendentals=0,
        bytes_accessed=2 * N * d_pad * itemsize + d_pad * jnp.dtype(w.dtype).itemsize,
    )

    extra_kwargs = {}
    if donate_embedding and out_dtype == graph_embedding.dtype:
        extra_kwargs["input_output_aliases"] = {1: 0}

    out = pl.pallas_call(
        _downstream_prompt_kernel,
        out_shape=jax.ShapeDtypeStruct((N, d_pad), out_dtype),
        grid=grid,
        in_specs=[
            pl.BlockSpec((1, d_pad), lambda i: (0, 0)),    # weight row: resident block
            pl.BlockSpec((tn, d_pad), lambda i: (i, 0)),   # rows tiled along the grid
        ],
        out_specs=pl.BlockSpec((tn, d_pad), lambda i: (i, 0)),
        compiler_params=pltpu.CompilerParams(
            dimension_semantics=("parallel",),             # v7x: shard rows across 2 TCs
            vmem_limit_bytes=int(1.5 * vmem_block_budget),
        ),
        cost_estimate=cost,
        **extra_kwargs,
    )(w, g)

    if d_pad != D:
        out = out[:, :D]
    return out


def make_weight(hid_units, key):
    # Deterministic xavier_uniform_ equivalent for a (1, hid_units) parameter:
    # fan_in = hid_units, fan_out = 1 -> bound = sqrt(6 / (fan_in + fan_out)).
    bound = (6.0 / (hid_units + 1.0)) ** 0.5
    return jax.random.uniform(
        key, (1, hid_units), dtype=jnp.float32, minval=-bound, maxval=bound
    )


if __name__ == "__main__":
    key = jax.random.PRNGKey(0)
    k_w, k_g, k_w2, k_g2 = jax.random.split(key, 4)

    # Case 1: lane-dense hidden dim; force the Pallas path (the default size-based
    # fallback would inline an example this small).
    hid_units, n_rows = 128, 16
    weight = make_weight(hid_units, k_w)
    graph_embedding = jax.random.normal(k_g, (n_rows, hid_units), dtype=jnp.float32)

    out = downstream_prompt_forward(weight, graph_embedding, min_pallas_bytes=0)
    out = jax.block_until_ready(out)
    ref = weight * graph_embedding
    assert out.shape == ref.shape
    assert jnp.allclose(out, ref, atol=1e-6, rtol=1e-6)

    # Case 2: non-multiple-of-128 hidden dim exercises the lane-padding path
    # (and a partial last row block).
    hid_units2, n_rows2 = 96, 24
    weight2 = make_weight(hid_units2, k_w2)
    graph_embedding2 = jax.random.normal(k_g2, (n_rows2, hid_units2), dtype=jnp.float32)
    out2 = jax.block_until_ready(
        downstream_prompt_forward(weight2, graph_embedding2, min_pallas_bytes=0)
    )
    ref2 = weight2 * graph_embedding2
    assert out2.shape == ref2.shape
    assert jnp.allclose(out2, ref2, atol=1e-6, rtol=1e-6)

    # Case 3: default size-based fallback (tiny input stays as a plain, fusible XLA mul).
    out3 = jax.block_until_ready(downstream_prompt_forward(weight, graph_embedding))
    assert jnp.allclose(out3, ref, atol=1e-6, rtol=1e-6)

    print("KERNEL_OK")
</pallas_src>

<mosaic_0001>
module attributes {stable_mosaic.version = 11 : i64} {
  func.func @_downstream_prompt_kernel(%arg0: i32, %arg1: memref<1x128xf32, #tpu.memory_space<vmem>>, %arg2: memref<8x128xf32, #tpu.memory_space<vmem>>, %arg3: memref<8x128xf32, #tpu.memory_space<vmem>>) attributes {dimension_semantics = [#tpu.dimension_semantics<parallel>], iteration_bounds = array<i64: 2>, scalar_prefetch = 0 : i64, scratch_operands = 0 : i64, tpu.core_type = #tpu.core_type<tc>, window_params = [{pipeline_mode = #tpu.pipeline_mode<synchronous>, transform_indices = @transform_0, window_bounds = array<i64: 1, 128>}, {transform_indices = @transform_1, window_bounds = array<i64: 8, 128>}, {transform_indices = @transform_2, window_bounds = array<i64: 8, 128>}]} {
    %c0 = arith.constant 0 : index
    %c0_0 = arith.constant 0 : index
    %0 = vector.load %arg1[%c0, %c0_0] : memref<1x128xf32, #tpu.memory_space<vmem>>, vector<1x128xf32>
    %c0_1 = arith.constant 0 : index
    %c0_2 = arith.constant 0 : index
    %1 = vector.load %arg2[%c0_1, %c0_2] : memref<8x128xf32, #tpu.memory_space<vmem>>, vector<8x128xf32>
    %2 = vector.broadcast %0 : vector<1x128xf32> to vector<8x128xf32>
    %3 = arith.mulf %2, %1 : vector<8x128xf32>
    %c0_3 = arith.constant 0 : index
    %c0_4 = arith.constant 0 : index
    %4 = vector.load %arg3[%c0_3, %c0_4] : memref<8x128xf32, #tpu.memory_space<vmem>>, vector<8x128xf32>
    tpu.vector_store %arg3[%c0_3, %c0_4], %3 {strides = array<i32>} : memref<8x128xf32, #tpu.memory_space<vmem>>, vector<8x128xf32>,
    return
  }
  func.func @transform_0(%arg0: i32) -> (i32, i32) {
    %c0_i32 = arith.constant 0 : i32
    %c0_i32_0 = arith.constant 0 : i32
    %c0_i32_1 = arith.constant 0 : i32
    return %c0_i32, %c0_i32_0 : i32, i32
  }
  func.func @transform_1(%arg0: i32) -> (i32, i32) {
    %c0_i32 = arith.constant 0 : i32
    %c0_i32_0 = arith.constant 0 : i32
    return %arg0, %c0_i32 : i32, i32
  }
  func.func @transform_2(%arg0: i32) -> (i32, i32) {
    %c0_i32 = arith.constant 0 : i32
    %c0_i32_0 = arith.constant 0 : i32
    return %arg0, %c0_i32 : i32, i32
  }
}

</mosaic_0001>

<bundles_post_ra>
// kernel: tpu_custom_call.1
= control target key start
LH: loop header
LB: loop body
LE: loop exit
PB: predicated region body
PF: predicated region fallthrough
CT: control target
= control target key end

     0   :  { %7 = vsyncpa [#allocation3], 0  ;;  %s699_s0 = inlined_call_operand.hbm [shape: f32[1,128], index: 0, kind: input, shape index: {}]   ;;  %s700_s1 = inlined_call_operand.hbm [shape: f32[16,128], index: 1, kind: input, shape index: {}]   ;;  %s701_s2 = inlined_call_operand.hbm [shape: f32[16,128], index: 2, kind: output, shape index: {}]  }
   0x1   :  { %8 = vsyncpa [#allocation6], 0 }
   0x2   :  { %10 = vsyncpa [#allocation6 + $0x1], 0 }
   0x3   :  { %11 = vsyncpa [#allocation4], 0 }
   0x4   :  { %13 = vsyncpa [#allocation4 + $0x1], 0  ;;  %s498_s9 = smov 0   ;;  %s500_s10 = smov 0  }
   0x5   :  { %s502_s11 = smov 0   ;;  %s504_s12 = smov 0  }
   0x6 LB: > { %s519_s13 = sadd.s32 4294967295, %s478_s12   ;;  %s278_s14 = sadd.s32 4294967294, %s478_s12   ;;  %s478_s12 = sphi %s504_s12, %s725_s12   ;;  %s474_s11 = sphi %s502_s11, %s724_s11   ;;  %s470_s10 = sphi %s500_s10, %s723_s10   ;;  %s466_s9 = sphi %s498_s9, %s722_s9  }
   0x7   : > { %p60_p0 = scmp.ne.s32.totalorder %s470_s10, %s466_s9  ;;  %p702_p1 = scmp.eq.s32.totalorder %s519_s13, 0 }
   0x8   : > { %p90_p3 = scmp.eq.s32.totalorder %s278_s14, 1  ;;  %p279_p5 = scmp.ge.s32.totalorder %s478_s12, 1 }
   0x9   : > { %p528_p4 = por %p702_p1, %p60_p0  ;;  %p97_p7 = scmp.lt.s32.totalorder %s478_s12, 3 }
   0xa   : > { %p533_p6 = por %p90_p3, %p60_p0  ;;  %s480_s18 = smov [#allocation2]  }
   0xb   : > { %s705_s15 = scalar_select %p528_p4, 1, 0 }
   0xc   : > { %s706_s16 = scalar_select %p533_p6, 1, 0 }
   0xd   : > { %p538_p8 = pnand %p279_p5, %p97_p7  ;;  %s110_s19 = sshll.u32 %s480_s18, 4  ;;  %s111_s19 = int_to_ptr.vmem [resolvable:$true] %s110_s19 }
   0xe   : > { %s546_s20 = sadd.s32 1, %s478_s12   ;;  %s47_s24 = sadd.s32 1, %s474_s11 }
   0xf   : > { %s707_s17 = scalar_select %p538_p8, 1, 0 }
  0x10   : > { %p301_p10 = pneg %p538_p8  ;;  %s44_s22 = ssub.s32 %s478_s12, %s546_s20 }
  0x11   : > { %p556_p12 = scmp.eq.s32.totalorder %s44_s22, 0  ;;  %s350_s27 = scalar_lea.hbm %s699_s0, 16 }
  0x12   : > { %p550_p11 = pnand %p301_p10, %p702_p1  ;;  %p351_p0 = scmp.ne.s32.totalorder %s699_s0, %s350_s27 }
  0x13   : > { %s709_s23 = scalar_select %p556_p12, 1, 0 }
  0x14   : > { %p352_p3 = pneg %p550_p11  ;;  %p357_p10 = scmp.lt.u32.totalorder %s350_s27, %s699_s0 }
  0x16   : > { %p353_p5 = pnand %p352_p3, %p351_p0 }
  0x18   : > { %p354_p7 = pneg %p353_p5 }
  0x1a   : > { %p359_p9 = pnand %p357_p10, %p354_p7 }
  0x1c   : > { %362 = shalt.err (!%p359_p9)
}
  0x1d   : > { %s363_s4 = scalar_lea.vmem %s111_s19, 16  ;;  %s370_s5 = scalar_lea.vmem %s111_s19, 32 }
  0x1e   : > { %p364_p1 = scmp.ne.s32.totalorder %s111_s19, %s363_s4  ;;  %p371_p6 = scmp.lt.s32.totalorder %s111_s19, %s111_s19 }
  0x1f   : > { %p372_p4 = scmp.lt.s32.totalorder %s370_s5, %s363_s4 }
  0x20   : > { %p366_p2 = pnand %p364_p1, %p352_p3 }
  0x21   : > { %p373_p8 = por %p372_p4, %p371_p6 }
  0x22   : > { %p367_p13 = pneg %p366_p2 }
  0x24   : > { %p374_p12 = pnand %p373_p8, %p367_p13 }
  0x26   : > { %377 = shalt.err (!%p374_p12)
}
  0x27   : > { %304 = dma.hbm_to_vmem [thread:$0]  (!%p550_p11), %s699_s0, 16, %s111_s19, [#allocation3]  }
  0x28   : > { %p710_p1 = scmp.ne.s32.totalorder %s709_s23, 0  ;;  %p55_p2 = scmp.eq.s32.totalorder %s478_s12, 0 }
  0x29   : > { %p711_p4 = scmp.ne.s32.totalorder %s474_s11, %s470_s10  ;;  %p712_p6 = scmp.eq.s32.totalorder %s519_s13, 1 }
  0x2a   : > { %s582_s8 = scalar_select %p710_p1, %s474_s11, %s47_s24  }
  0x2b   : > { %p590_p8 = por %p712_p6, %p711_p4  ;;  %p314_p9 = scmp.lt.s32.totalorder %s478_s12, 2 }
  0x2c   : > { %s121_s18 = sand.u32 1, %s474_s11   ;;  %p714_p12 = pmov %p711_p4 }
  0x2d   : > { %s282_s21 = sshll.u32 %s121_s18, 3  ;;  %s283_s22 = sshll.u32 %s478_s12, 7 }
  0x2e   : > { %p56_p13 = por %p55_p2, %p714_p12  ;;  %s603_s19 = scalar_lea.hbm %s700_s1, %s283_s22 }
  0x2f   : > { %s125_s23 = scalar_lea.vmem [#allocation5], %s282_s21  ;;  %s122_s28 = scalar_lea.sflag [#allocation6], %s121_s18 }
  0x30   : > { %s132_s24 = sshll.u32 %s125_s23, 4  ;;  %p605_p11 = pnand %p314_p9, %p56_p13  ;;  %s609_s24 = int_to_ptr.vmem [resolvable:$true] %s132_s24 }
  0x31   : > { %s378_s29 = scalar_lea.hbm %s603_s19, 128  ;;  %s383_s4 = scalar_lea.hbm %s700_s1, 256 }
  0x32   : > { %p379_p0 = scmp.ne.s32.totalorder %s603_s19, %s378_s29  ;;  %p380_p3 = pneg %p605_p11 }
  0x33   : > { %p384_p10 = scmp.lt.u32.totalorder %s603_s19, %s700_s1  ;;  %p385_p1 = scmp.lt.u32.totalorder %s383_s4, %s378_s29 }
  0x34   : > { %p381_p5 = pnand %p380_p3, %p379_p0  ;;  %p387_p4 = scmp.lt.u32.totalorder %s378_s29, %s603_s19 }
  0x35   : > { %p386_p2 = por %p385_p1, %p384_p10 }
  0x36   : > { %p382_p7 = pneg %p381_p5 }
  0x37   : > { %p388_p6 = por %p387_p4, %p386_p2 }
  0x39   : > { %p389_p9 = pnand %p388_p6, %p382_p7 }
  0x3b   : > { %392 = shalt.err (!%p389_p9)
}
  0x3c   : > { %s393_s7 = scalar_lea.vmem %s609_s24, 128  ;;  %s481_s18 = smov [#allocation5]  }
  0x3d   : > { %p394_p12 = scmp.ne.s32.totalorder %s609_s24, %s393_s7  ;;  %s398_s21 = sshll.u32 %s481_s18, 4  ;;  %s399_s21 = int_to_ptr.vmem [resolvable:$false] %s398_s21 }
  0x3e   : > { %s400_s22 = scalar_lea.vmem %s399_s21, 256  ;;  %p401_p5 = scmp.lt.s32.totalorder %s609_s24, %s399_s21 }
  0x3f   : > { %p396_p13 = pnand %p394_p12, %p380_p3  ;;  %p402_p10 = scmp.lt.s32.totalorder %s400_s22, %s393_s7 }
  0x41   : > { %p397_p0 = pneg %p396_p13  ;;  %p403_p1 = por %p402_p10, %p401_p5 }
  0x43   : > { %p404_p2 = pnand %p403_p1, %p397_p0 }
  0x45   : > { %407 = shalt.err (!%p404_p2)
}
  0x46   : > { %308 = dma.hbm_to_vmem [thread:$0]  (!%p605_p11), %s603_s19, 128, %s609_s24, %s122_s28  }
  0x47   : > { %p716_p7 = scmp.ne.s32.totalorder %s707_s17, 0 }
  0x48   : > { %p717_p3 = scmp.eq.s32.totalorder (!%p716_p7), %s519_s13, 0 }
  0x49   : > { %141 = sbr.rel (%p716_p7) target bundleno = 110 (0x6e), region = 28 }
  0x50   : > { %453 = dma.done.wait (%p717_p3), [#allocation3], 16   ;;  %p718_p4 = pmov %p717_p3 }
  0x51   : > { %s643_s25 = sand.u32 1, %s470_s10   ;;  %p719_p6 = scmp.ne.s32.totalorder %s705_s15, 0 }
  0x52   : > { %455 = vsyncadd (%p718_p4), [#allocation3], 4294967280  ;;  %s286_s26 = sshll.u32 %s643_s25, 3  ;;  %s148_s23 = scalar_lea.sflag [#allocation6], %s643_s25 }
  0x53   : > { %s151_s27 = scalar_lea.vmem [#allocation5], %s286_s26 }
  0x54   : > { %457 = dma.done.wait (%p719_p6), %s148_s23, 128  }
  0x55   : > { %459 = vsyncadd (%p719_p6), %s148_s23, 4294967168  ;;  %s171_s17 = scalar_lea.vmem [#allocation7], %s286_s26  ;;  %s290_s24 = sshll.u32 %s519_s13, 7  ;;  %v288_v0 = vld [vmem:[#allocation2] ss:$0 sm:$0xff]  ;;  %v173_v1 = vld [vmem:[%s151_s27] sm:$0xff] }
  0x56   : > { %s196_s19 = sshll.u32 %s171_s17, 4  ;;  %v180_v2 = vmul.f32 %v288_v0, %v173_v1  ;;  %s657_s30 = scalar_lea.hbm %s701_s2, %s290_s24  ;;  %s652_s19 = int_to_ptr.vmem [resolvable:$true] %s196_s19 }
  0x57   : > { %s183_s15 = scalar_lea.sflag [#allocation4], %s643_s25  ;;  %s408_s3 = scalar_lea.vmem %s652_s19, 128 }
  0x58   : > { %181 = vst [vmem:[%s171_s17] sm:$0xff] %v180_v2  ;;  %p409_p11 = scmp.ne.s32.totalorder %s652_s19, %s408_s3  ;;  %s482_s13 = smov [#allocation7]  }
  0x59   : > { %s412_s4 = sshll.u32 %s482_s13, 4  ;;  %s413_s4 = int_to_ptr.vmem [resolvable:$false] %s412_s4 }
  0x5a   : > { %p410_p9 = pnand %p409_p11, %p590_p8  ;;  %s414_s5 = scalar_lea.vmem %s413_s4, 256 }
  0x5b   : > { %p415_p13 = scmp.lt.s32.totalorder %s652_s19, %s413_s4  ;;  %p416_p0 = scmp.lt.s32.totalorder %s414_s5, %s408_s3 }
  0x5c   : > { %p411_p12 = pneg %p410_p9 }
  0x5d   : > { %p417_p5 = por %p416_p0, %p415_p13 }
  0x5f   : > { %p418_p10 = pnand %p417_p5, %p411_p12 }
  0x61   : > { %421 = shalt.err (!%p418_p10)
}
  0x62   : > { %s422_s6 = scalar_lea.hbm %s657_s30, 128  ;;  %s426_s21 = scalar_lea.hbm %s701_s2, 256 }
  0x63   : > { %p423_p1 = scmp.ne.s32.totalorder %s657_s30, %s422_s6  ;;  %p427_p3 = scmp.lt.u32.totalorder %s657_s30, %s701_s2 }
  0x64   : > { %p428_p4 = scmp.lt.u32.totalorder %s426_s21, %s422_s6  ;;  %p430_p11 = scmp.lt.u32.totalorder %s422_s6, %s657_s30 }
  0x65   : > { %p424_p2 = pnand %p423_p1, %p590_p8 }
  0x66   : > { %p429_p6 = por %p428_p4, %p427_p3 }
  0x67   : > { %p425_p7 = pneg %p424_p2 }
  0x68   : > { %p431_p9 = por %p430_p11, %p429_p6 }
  0x6a   : > { %p432_p12 = pnand %p431_p9, %p425_p7 }
  0x6c   : > { %435 = shalt.err (!%p432_p12)
}
  0x6d   : > { %299 = dma.vmem_to_hbm [thread:$0]  (%p590_p8), %s652_s19, 128, %s657_s30, %s183_s15  }
  0x6e PF: > { %s208_s26 = sand.u32 1, %s466_s9   ;;  %p720_p13 = scmp.ne.s32.totalorder %s706_s16, 0 }
  0x6f   : > { %p721_p0 = scmp.ge.s32.totalorder %s478_s12, 2  ;;  %s209_s23 = scalar_lea.sflag [#allocation4], %s208_s26 }
  0x71   : > { %p310_p5 = pnand %p721_p0, %p720_p13 }
  0x73   : > { %461 = dma.done.wait (!%p310_p5), %s209_s23, 128  }
  0x74   : > { %463 = vsyncadd (!%p310_p5), %s209_s23, 4294967168  ;;  %p16_p10 = scmp.ge.s32.totalorder %s546_s20, 4   ;;  %s722_s9 = smov %s470_s10 }
  0x75   : > { %s723_s10 = smov %s474_s11  ;;  %s724_s11 = smov %s582_s8 }
  0x76   : > { %s725_s12 = smov %s546_s20  ;;  %18 = sbr.rel (!%p16_p10) target bundleno = 6 (0x6), region = 78 }
  0x7d   :  { %214 = vsyncpa [#allocation3], 1 }
  0x7e   :  { %216 = vsyncpa [#allocation3 + $0x1], 1 }
  0x7f   :  { %217 = vsyncpa [#allocation6], 1 }
  0x80   :  { %219 = vsyncpa [#allocation6 + $0x1], 1 }
  0x81   :  { %220 = vsyncpa [#allocation4], 1 }
  0x82   :  { %222 = vsyncpa [#allocation4 + $0x1], 1 }

</bundles_post_ra>
